<compile_context>
chip_gen: v5e
topology: v5e:2x2
jax: 0.10.0
libtpu: 0.0.40
codegen_flags: <defaults>
</compile_context>

<pallas_src>
import jax
import jax.numpy as jnp
from jax.experimental import pallas as pl
from jax.experimental.pallas import tpu as pltpu

# Exponents of the Pow sub-functions composing Div(Pow(I(), NF), Pow(I(), NG)).
NF = 2
NG = 3

SUBLANES = 8            # f32 sublane height
LANE_WIDTH = 512        # last-dim width of the slab (multiple of 128)
BLOCK_ROWS_MAX = 1024   # 1024 * 512 * 4 B = 2 MiB per f32 tile


def div_kernel(x_ref, val_ref, grad_ref):
    x = x_ref[...]
    # Div(Pow(I,2), Pow(I,3)):
    #   f = x**2, df = 2x, g = x**3, dg = 3x**2
    #   value = f/g                   = 1/x
    #   grad  = (df*g - f*dg)/g**2
    #         = (2x**4 - 3x**4)/x**6  = -1/x**2
    # Exact reciprocal (not approx) so results match the quotient-rule
    # reference to ~1 ulp.
    inv = 1.0 / x
    val_ref[...] = inv
    grad_ref[...] = -(inv * inv)


def div_pallas(x):
    """x: float32 tensor (any shape).  Returns (value, grad), same shape as x."""
    orig_shape = x.shape
    dtype = x.dtype
    total = x.size

    # Flatten to a lane-dense (rows, LANE_WIDTH) slab, padded so rows is a
    # multiple of 8 (legal (8,128) tiling).  Pad with 1.0 so padded lanes stay
    # finite; they are sliced off before returning.
    quantum = SUBLANES * LANE_WIDTH
    padded_total = pl.cdiv(total, quantum) * quantum
    flat = x.reshape(-1)
    if padded_total != total:
        flat = jnp.concatenate(
            [flat, jnp.ones((padded_total - total,), dtype=dtype)]
        )
    rows = padded_total // LANE_WIDTH
    x2d = flat.reshape(rows, LANE_WIDTH)

    # Up to 2 MiB tiles; 1 input + 2 outputs, double-buffered -> ~12 MiB VMEM,
    # well under default scoped limits on v5e/v6e/v7x.
    block_rows = min(rows, BLOCK_ROWS_MAX)
    grid = (pl.cdiv(rows, block_rows),)

    spec = pl.BlockSpec((block_rows, LANE_WIDTH), lambda i: (i, 0))

    val2d, grad2d = pl.pallas_call(
        div_kernel,
        out_shape=(
            jax.ShapeDtypeStruct((rows, LANE_WIDTH), dtype),
            jax.ShapeDtypeStruct((rows, LANE_WIDTH), dtype),
        ),
        grid=grid,
        in_specs=[spec],
        out_specs=(spec, spec),
        compiler_params=pltpu.CompilerParams(
            dimension_semantics=("parallel",)
        ),
    )(x2d)

    val = val2d.reshape(-1)[:total].reshape(orig_shape)
    grad = grad2d.reshape(-1)[:total].reshape(orig_shape)
    return val, grad


def div_reference(x):
    """Literal quotient-rule reference matching the PyTorch module."""
    f = x ** NF
    df = NF * (x ** (NF - 1))
    g = x ** NG
    dg = NG * (x ** (NG - 1))
    return f / g, (df * g - f * dg) / (g ** 2)


if __name__ == "__main__":
    key = jax.random.PRNGKey(0)
    # NCHW input; keep values away from zero so the division is well-conditioned.
    x = jax.random.uniform(
        key, (2, 4, 16, 16), dtype=jnp.float32, minval=0.5, maxval=1.5
    )

    val, grad = div_pallas(x)
    jax.block_until_ready((val, grad))

    val_ref, grad_ref = div_reference(x)
    assert val.shape == x.shape and grad.shape == x.shape
    assert jnp.allclose(val, val_ref, rtol=1e-5, atol=1e-5)
    assert jnp.allclose(grad, grad_ref, rtol=1e-5, atol=1e-5)

    print("KERNEL_OK")
</pallas_src>

<mosaic_0001>
module attributes {stable_mosaic.version = 11 : i64} {
  func.func @div_kernel(%arg0: i32, %arg1: memref<8x512xf32, #tpu.memory_space<vmem>>, %arg2: memref<8x512xf32, #tpu.memory_space<vmem>>, %arg3: memref<8x512xf32, #tpu.memory_space<vmem>>) attributes {dimension_semantics = [#tpu.dimension_semantics<parallel>], iteration_bounds = array<i64: 1>, scalar_prefetch = 0 : i64, scratch_operands = 0 : i64, tpu.core_type = #tpu.core_type<tc>, window_params = [{transform_indices = @transform_0, window_bounds = array<i64: 8, 512>}, {transform_indices = @transform_1, window_bounds = array<i64: 8, 512>}, {transform_indices = @transform_2, window_bounds = array<i64: 8, 512>}]} {
    %c0 = arith.constant 0 : index
    %c0_0 = arith.constant 0 : index
    %0 = vector.load %arg1[%c0, %c0_0] : memref<8x512xf32, #tpu.memory_space<vmem>>, vector<8x512xf32>
    %cst = arith.constant 1.000000e+00 : f32
    %1 = vector.broadcast %cst : f32 to vector<8x512xf32>
    %2 = arith.divf %1, %0 : vector<8x512xf32>
    %c0_1 = arith.constant 0 : index
    %c0_2 = arith.constant 0 : index
    %3 = vector.load %arg2[%c0_1, %c0_2] : memref<8x512xf32, #tpu.memory_space<vmem>>, vector<8x512xf32>
    tpu.vector_store %arg2[%c0_1, %c0_2], %2 {strides = array<i32>} : memref<8x512xf32, #tpu.memory_space<vmem>>, vector<8x512xf32>,
    %4 = arith.mulf %2, %2 : vector<8x512xf32>
    %cst_3 = arith.constant 0.000000e+00 : f32
    %5 = vector.broadcast %cst_3 : f32 to vector<8x512xf32>
    %6 = arith.subf %5, %4 : vector<8x512xf32>
    %c0_4 = arith.constant 0 : index
    %c0_5 = arith.constant 0 : index
    %7 = vector.load %arg3[%c0_4, %c0_5] : memref<8x512xf32, #tpu.memory_space<vmem>>, vector<8x512xf32>
    tpu.vector_store %arg3[%c0_4, %c0_5], %6 {strides = array<i32>} : memref<8x512xf32, #tpu.memory_space<vmem>>, vector<8x512xf32>,
    return
  }
  func.func @transform_0(%arg0: i32) -> (i32, i32) {
    %c0_i32 = arith.constant 0 : i32
    %c0_i32_0 = arith.constant 0 : i32
    return %arg0, %c0_i32 : i32, i32
  }
  func.func @transform_1(%arg0: i32) -> (i32, i32) {
    %c0_i32 = arith.constant 0 : i32
    %c0_i32_0 = arith.constant 0 : i32
    return %arg0, %c0_i32 : i32, i32
  }
  func.func @transform_2(%arg0: i32) -> (i32, i32) {
    %c0_i32 = arith.constant 0 : i32
    %c0_i32_0 = arith.constant 0 : i32
    return %arg0, %c0_i32 : i32, i32
  }
}

</mosaic_0001>

<bundles_post_ra>
// kernel: tpu_custom_call.1
= control target key start
LH: loop header
LB: loop body
LE: loop exit
PB: predicated region body
PF: predicated region fallthrough
CT: control target
= control target key end

     0   :  { %8 = vsyncpa [#allocation3], 0  ;;  %s307_s0 = inlined_call_operand.hbm [shape: f32[8,512], index: 0, kind: input, shape index: {}]   ;;  %s308_s1 = inlined_call_operand.hbm [shape: f32[8,512], index: 1, kind: output, shape index: {0}]   ;;  %s309_s2 = inlined_call_operand.hbm [shape: f32[8,512], index: 2, kind: output, shape index: {1}]  }
   0x1   :  { %9 = vsyncpa [#allocation4], 0 }
   0x2   :  { %10 = vsyncpa [#allocation7], 0  ;;  %s16_s11 = sshll.u32 %s307_s0, 4  ;;  %s228_s12 = smov [#allocation2]   ;;  %s17_s11 = int_to_ptr.hbm [resolvable:$true] %s16_s11 }
   0x3   :  { %s18_s13 = sshll.u32 %s228_s12, 4  ;;  %s19_s13 = int_to_ptr.vmem [resolvable:$true] %s18_s13 }
   0x4   :  { %21 = dma.hbm_to_vmem [thread:$0]  %s17_s11, 512, %s19_s13, [#allocation3]  }
   0x5   :  { %222 = dma.done.wait [#allocation3], 512  }
   0x6   :  { %223 = vsyncadd [#allocation3], 4294966784  ;;  %v26_v0 = vld [vmem:[#allocation2] sm:$0xff]  ;;  %v27_v1 = vld [vmem:[#allocation2 + $0x8] sm:$0xff]  ;;  %s229_s0 = smov [#allocation5]   ;;  %s113_s17 = sshll.u32 %s308_s1, 4  ;;  %s114_s17 = int_to_ptr.hbm [resolvable:$true] %s113_s17 }
   0x7   :  { %v28_v2 = vld [vmem:[#allocation2 + $0x10] sm:$0xff]  ;;  %142 = vrcp.f32 %v26_v0  ;;  %v29_v3 = vld [vmem:[#allocation2 + $0x18] sm:$0xff]  ;;  %v39_v4 = vand.u32 2147483647, %v26_v0  ;;  %v41_v5 = vand.u32 2147483648, %v26_v0  ;;  %v56_v6 = vand.u32 2147483648, %v27_v1 }
   0x8   :  { %144 = vrcp.f32 %v27_v1  ;;  %vm35_vm0 = vweird.f32 %v26_v0  ;;  %vm50_vm1 = vweird.f32 %v27_v1  ;;  %v54_v10 = vand.u32 2147483647, %v27_v1  ;;  %s111_s14 = sshll.u32 %s229_s0, 4  ;;  %s230_s1 = smov [#allocation6]   ;;  %s112_s14 = int_to_ptr.vmem [resolvable:$true] %s111_s14 }
   0x9   :  { %146 = vrcp.f32 %v28_v2  ;;  %vm249_vm2 = vcmp.eq.f32.partialorder %v39_v4, 8.507059e+37  ;;  %v42_v13 = vor.u32 1.1754944e-38, %v41_v5  ;;  %vm65_vm3 = vweird.f32 %v28_v2  ;;  %s122_s18 = sshll.u32 %s230_s1, 4  ;;  %s124_s21 = sshll.u32 %s309_s2, 4  ;;  %s123_s18 = int_to_ptr.vmem [resolvable:$true] %s122_s18  ;;  %s125_s21 = int_to_ptr.hbm [resolvable:$true] %s124_s21 }
   0xa   :  { %148 = vrcp.f32 %v29_v3  ;;  %v57_v16 = vor.u32 1.1754944e-38, %v56_v6  ;;  %v69_v20 = vand.u32 2147483647, %v28_v2  ;;  %v71_v21 = vand.u32 2147483648, %v28_v2 }
   0xb   :  { %vm80_vm8 = vweird.f32 %v29_v3  ;;  %v84_v27 = vand.u32 2147483647, %v29_v3  ;;  %v86_v28 = vand.u32 2147483648, %v29_v3  ;;  %vm263_vm11 = vcmp.eq.f32.partialorder %v54_v10, 8.507059e+37 }
   0xc   :  { %v72_v36 = vor.u32 1.1754944e-38, %v71_v21  ;;  %vm274_vm13 = vcmp.eq.f32.partialorder %v69_v20, 8.507059e+37 }
   0xd   :  { %v143_v7 = vpop.eup %142  ;;  %vm287_vm15 = vcmp.eq.f32.partialorder %v84_v27, 8.507059e+37  ;;  %v87_v45 = vor.u32 1.1754944e-38, %v86_v28 }
   0xe   :  { %v145_v8 = vpop.eup %144  ;;  %v31_v9 = vmul.f32 %v143_v7, %v26_v0  ;;  %vm36_vm4 = vweird.f32 %v143_v7 }
   0xf   :  { %v147_v11 = vpop.eup %146  ;;  %v46_v14 = vmul.f32 %v145_v8, %v27_v1  ;;  %vm51_vm5 = vweird.f32 %v145_v8  ;;  %vm254_vm7 = vmor %vm35_vm0, %vm36_vm4 }
  0x10   :  { %v32_v15 = vsub.f32 1.0, %v31_v9  ;;  %v61_v17 = vmul.f32 %v147_v11, %v28_v2  ;;  %v149_v18 = vpop.eup %148  ;;  %vm66_vm6 = vweird.f32 %v147_v11  ;;  %vm259_vm9 = vmor %vm50_vm1, %vm51_vm5 }
  0x11   :  { %v47_v19 = vsub.f32 1.0, %v46_v14  ;;  %v76_v24 = vmul.f32 %v149_v18, %v29_v3  ;;  %vm81_vm10 = vweird.f32 %v149_v18  ;;  %vm268_vm12 = vmor %vm65_vm3, %vm66_vm6 }
  0x12   :  { %v33_v22 = vmul.f32 %v143_v7, %v32_v15  ;;  %v62_v23 = vsub.f32 1.0, %v61_v17  ;;  %vm283_vm14 = vmor %vm80_vm8, %vm81_vm10 }
  0x13   :  { %v48_v26 = vmul.f32 %v145_v8, %v47_v19  ;;  %v77_v32 = vsub.f32 1.0, %v76_v24 }
  0x14   :  { %v34_v29 = vadd.f32 %v143_v7, %v33_v22  ;;  %v63_v31 = vmul.f32 %v147_v11, %v62_v23 }
  0x15   :  { %v49_v33 = vadd.f32 %v145_v8, %v48_v26  ;;  %v78_v40 = vmul.f32 %v149_v18, %v77_v32 }
  0x16   :  { %v38_v37 = vsel %vm254_vm7, %v143_v7, %v34_v29  ;;  %v64_v38 = vadd.f32 %v147_v11, %v63_v31 }
  0x17   :  { %v43_v41 = vsel %vm249_vm2, %v42_v13, %v38_v37  ;;  %v53_v42 = vsel %vm259_vm9, %v145_v8, %v49_v33  ;;  %v79_v49 = vadd.f32 %v149_v18, %v78_v40 }
  0x18   :  { %90 = vst [vmem:[#allocation5] sm:$0xff] %v43_v41  ;;  %v94_v46 = vmul.f32 %v43_v41, %v43_v41  ;;  %v58_v47 = vsel %vm263_vm11, %v57_v16, %v53_v42  ;;  %v68_v48 = vsel %vm268_vm12, %v147_v11, %v64_v38 }
  0x19   :  { %91 = vst [vmem:[#allocation5 + $0x8] sm:$0xff] %v58_v47  ;;  %v95_v50 = vmul.f32 %v58_v47, %v58_v47  ;;  %v73_v51 = vsel %vm274_vm13, %v72_v36, %v68_v48  ;;  %v83_v53 = vsel %vm283_vm14, %v149_v18, %v79_v49 }
  0x1a   :  { %92 = vst [vmem:[#allocation5 + $0x10] sm:$0xff] %v73_v51  ;;  %v96_v52 = vmul.f32 %v73_v51, %v73_v51  ;;  %v98_v54 = vsub.f32 0.0, %v94_v46  ;;  %v88_v55 = vsel %vm287_vm15, %v87_v45, %v83_v53 }
  0x1b   :  { %v99_v56 = vsub.f32 0.0, %v95_v50  ;;  %93 = vst [vmem:[#allocation5 + $0x18] sm:$0xff] %v88_v55  ;;  %v97_v57 = vmul.f32 %v88_v55, %v88_v55 }
  0x1c   :  { %v100_v58 = vsub.f32 0.0, %v96_v52  ;;  %102 = vst [vmem:[#allocation6] sm:$0xff] %v98_v54  ;;  %116 = dma.vmem_to_hbm [thread:$0]  %s112_s14, 512, %s114_s17, [#allocation4]  }
  0x1d   :  { %103 = vst [vmem:[#allocation6 + $0x8] sm:$0xff] %v99_v56  ;;  %v101_v59 = vsub.f32 0.0, %v97_v57 }
  0x1e   :  { %104 = vst [vmem:[#allocation6 + $0x10] sm:$0xff] %v100_v58 }
  0x1f   :  { %105 = vst [vmem:[#allocation6 + $0x18] sm:$0xff] %v101_v59 }
  0x20   :  { %127 = dma.vmem_to_hbm [thread:$0]  %s123_s18, 512, %s125_s21, [#allocation7]  }
  0x21   :  { %224 = dma.done.wait [#allocation4], 512  }
  0x22   :  { %225 = vsyncadd [#allocation4], 4294966784 }
  0x23   :  { %226 = dma.done.wait [#allocation7], 512  }
  0x24   :  { %227 = vsyncadd [#allocation7], 4294966784 }
  0x25   :  { %136 = vsyncpa [#allocation3], 1 }
  0x26   :  { %137 = vsyncpa [#allocation4], 1 }
  0x27   :  { %138 = vsyncpa [#allocation7], 1 }

</bundles_post_ra>
